<compile_context>
chip_gen: v7x
topology: tpu7x:2x2x1
jax: 0.10.0
libtpu: 0.0.40
codegen_flags: <defaults>
</compile_context>

<pallas_src>
import functools

import jax
import jax.numpy as jnp
from jax import lax
from jax.experimental import pallas as pl
from jax.experimental.pallas import tpu as pltpu

BN_EPS = 1e-5
# 3x3 conv tap offsets (ky-1, kx-1); order matches PyTorch OIHW weight order.
_TAPS = tuple((oy, ox) for oy in (-1, 0, 1) for ox in (-1, 0, 1))


# ---------------------------------------------------------------------------
# Runtime probe: pltpu.roll rotation convention (one 1-vreg kernel, cached).
# We need shifted[p] == a[(p + off) % N].  Under jnp.roll semantics
# (out[p] = a[(p - s) % N]) that means s = -off; under the opposite
# convention s = +off.  Bake the sign in as a static constant.
# ---------------------------------------------------------------------------
@functools.lru_cache(maxsize=1)
def _roll_shift_sign():
    def probe(x_ref, o_ref):
        o_ref[...] = pltpu.roll(x_ref[...], shift=1, axis=1)

    x = jnp.tile(jnp.arange(128, dtype=jnp.float32)[None, :], (8, 1))
    y = pl.pallas_call(
        probe, out_shape=jax.ShapeDtypeStruct((8, 128), jnp.float32))(x)
    first = int(jax.device_get(y[0, 0]))
    if first == 127:          # matches jnp.roll: out[p] = x[(p - shift) % N]
        return -1
    if first == 1:            # opposite convention
        return 1
    raise RuntimeError(f"unexpected pltpu.roll behaviour (probe={first})")


# ---------------------------------------------------------------------------
# Fused Pallas kernel: one batch image per grid step.
# Layout inside the kernel: channels-major (C, H*W) per image.
# ---------------------------------------------------------------------------
def _msfm_kernel(x_ref,
                 w_cv1_ref, b_cv1_ref,
                 w_m1_ref, b_m1_ref, w_m2_ref, b_m2_ref,
                 w_gap_ref, b_gap_ref,
                 w_cv2y_ref, w_cv2z_ref, b_cv2_ref,
                 tap_mask_ref, pool_h_ref, pool_w_ref, exp_h_ref, exp_w_ref,
                 o_ref, slab_ref, *, H, W, c, shift_sign):
    HW = H * W
    f32 = jnp.float32
    bf16 = jnp.bfloat16

    def silu(v):
        return v * jax.nn.sigmoid(v)

    x = x_ref[...].astype(bf16)                                   # (C1, HW)

    # ---- cv1: single dot.  Output rows are host-permuted to [y1 ; y0] so the
    #      MatchNeck input is an offset-0 slice and cv2 consumes y whole. ----
    y = silu(jnp.dot(w_cv1_ref[...], x, preferred_element_type=f32)
             + b_cv1_ref[...])                                    # (2c, HW) f32
    y1 = y[:c, :]                                                 # (c, HW)

    # ---- MatchNeck: two 3x3 convs, each ONE MXU dot over a 9-tap slab. ----
    def conv3x3(a, w9_ref, b_ref):
        # Build the (9c, HW) slab: tap k = activation circularly rolled by
        # oy*W+ox along HW, with out-of-image positions zeroed by the mask
        # (this covers both image edges and the circular wraparound).
        for k, (oy, ox) in enumerate(_TAPS):
            off = oy * W + ox
            if off == 0:
                win = a
            else:
                win = (pltpu.roll(a, shift=(shift_sign * off) % HW, axis=1)
                       * tap_mask_ref[k])
            slab_ref[pl.ds(k * c, c), :] = win
        return silu(jnp.dot(w9_ref[...], slab_ref[...].astype(bf16),
                            preferred_element_type=f32) + b_ref[...])

    z = conv3x3(y1, w_m1_ref, b_m1_ref)                           # MatchNeck.cv1
    z = conv3x3(z, w_m2_ref, b_m2_ref)                            # MatchNeck.cv2
    zb = z.astype(bf16)

    # ---- MatchNeck_Inner (pooling / broadcast via bf16 one-hot matmuls) ----
    ph = jnp.dot(zb, pool_h_ref[...],
                 preferred_element_type=f32) * (1.0 / W)          # (c, H) mean over W
    pw = jnp.dot(zb, pool_w_ref[...],
                 preferred_element_type=f32) * (1.0 / H)          # (c, W) mean over H
    sh = jax.nn.sigmoid(ph)
    sw = jax.nn.sigmoid(pw)
    gh = jax.nn.sigmoid(ph * sh).astype(bf16)                     # (c, H)
    gw = jax.nn.sigmoid(pw * sw).astype(bf16)                     # (c, W)
    gate_h = jnp.dot(gh, exp_h_ref[...], preferred_element_type=f32)   # (c, HW)
    gate_w = jnp.dot(gw, exp_w_ref[...], preferred_element_type=f32)   # (c, HW)

    # gap branch (flipped): Conv1x1+BN is linear, so conv(mean(z)) == mean(conv(z));
    # the global mean is itself the mean over H of the already-pooled ph.
    t = jnp.dot(w_gap_ref[...], ph.astype(bf16),
                preferred_element_type=f32)                        # (c, H)
    g = silu(jnp.mean(t, axis=1, keepdims=True) + b_gap_ref[...])  # (c, 1)
    mean_w = (jnp.sum(sh, axis=1, keepdims=True)
              + jnp.sum(sw, axis=1, keepdims=True)) / float(H + W)  # (c, 1)
    gate_c = jax.nn.sigmoid(g * mean_w)                            # (c, 1)

    zg = (z * gate_h * gate_w * gate_c).astype(bf16)               # (c, HW)

    # ---- cv2 over the implicit concat([y0, y1, zg]): two fat dots -----------
    out = (jnp.dot(w_cv2y_ref[...], y.astype(bf16), preferred_element_type=f32)
           + jnp.dot(w_cv2z_ref[...], zg, preferred_element_type=f32)
           + b_cv2_ref[...])
    o_ref[...] = silu(out)                          # lane-dense (C2, HW) store


# ---------------------------------------------------------------------------
# Host-side weight folding (BN -> conv weights), pre-transposed for the
# channels-major layout (out_t = W @ act_t), plus spatial constants.
# ---------------------------------------------------------------------------
def _fold_bn(p):
    scale = p["gamma"] / jnp.sqrt(p["var"] + BN_EPS)
    bias = p["beta"] - p["mean"] * scale
    return scale, bias


def _fold_1x1_t(p, dtype):
    """Conv1x1+BN folded for left-multiplication: (Cout, Cin), (Cout, 1)."""
    scale, bias = _fold_bn(p)
    w = p["w"][:, :, 0, 0] * scale[:, None]
    return w.astype(dtype), bias[:, None].astype(jnp.float32)


def _fold_3x3_t(p, dtype):
    """Conv3x3+BN folded into one (Cout, 9*Cin) slab weight + (Cout, 1) bias."""
    scale, bias = _fold_bn(p)
    w = p["w"] * scale[:, None, None, None]             # (Cout, Cin, 3, 3)
    w9 = jnp.concatenate([w[:, :, oy + 1, ox + 1] for (oy, ox) in _TAPS], axis=1)
    return w9.astype(dtype), bias[:, None].astype(jnp.float32)


def _spatial_constants(H, W):
    HW = H * W
    pos = jnp.arange(HW, dtype=jnp.int32)
    hh, ww = pos // W, pos % W
    masks = []
    for oy, ox in _TAPS:
        ok = ((hh + oy >= 0) & (hh + oy < H) & (ww + ox >= 0) & (ww + ox < W))
        masks.append(ok.astype(jnp.float32))
    tap_mask = jnp.stack(masks)[:, None, :]                     # (9, 1, HW) f32
    onehot_h = (hh[None, :] == jnp.arange(H)[:, None])          # (H, HW) bool
    onehot_w = (ww[None, :] == jnp.arange(W)[:, None])          # (W, HW)
    pool_h = onehot_h.T.astype(jnp.bfloat16)   # (HW, H): sum over W (scale 1/W in-kernel)
    pool_w = onehot_w.T.astype(jnp.bfloat16)   # (HW, W): sum over H (scale 1/H in-kernel)
    exp_h = onehot_h.astype(jnp.bfloat16)      # (H, HW): broadcast per-row gate
    exp_w = onehot_w.astype(jnp.bfloat16)      # (W, HW): broadcast per-col gate
    return tap_mask, pool_h, pool_w, exp_h, exp_w


# ---------------------------------------------------------------------------
# MSFM forward (single fused pallas_call)
# ---------------------------------------------------------------------------
def msfm_forward(x_nchw, params, c, *, compute_dtype=jnp.bfloat16):
    B, C1, H, W = x_nchw.shape
    HW = H * W
    C2 = params["cv2"]["w"].shape[0]

    w_cv1_t, b_cv1_t = _fold_1x1_t(params["cv1"], compute_dtype)   # (2c, C1)
    # Reorder cv1 output rows to [y1 ; y0]; cv2 columns are permuted to match.
    w_cv1_r = jnp.concatenate([w_cv1_t[c:], w_cv1_t[:c]], axis=0)
    b_cv1_r = jnp.concatenate([b_cv1_t[c:], b_cv1_t[:c]], axis=0)
    w_m1, b_m1 = _fold_3x3_t(params["m0_cv1"], compute_dtype)      # (c, 9c)
    w_m2, b_m2 = _fold_3x3_t(params["m0_cv2"], compute_dtype)
    w_gap, b_gap = _fold_1x1_t(params["m0_gap"], compute_dtype)    # (c, c)
    w_cv2_t, b_cv2 = _fold_1x1_t(params["cv2"], compute_dtype)     # (C2, 3c)
    w_cv2_y = jnp.concatenate([w_cv2_t[:, c:2 * c], w_cv2_t[:, :c]], axis=1)
    w_cv2_z = w_cv2_t[:, 2 * c:]

    tap_mask, pool_h, pool_w, exp_h, exp_w = _spatial_constants(H, W)

    # Free view: input stays NCHW, no HBM relayout pass in the wrapper.
    x_flat = x_nchw.reshape(B, C1, HW)

    consts = (w_cv1_r, b_cv1_r, w_m1, b_m1, w_m2, b_m2, w_gap, b_gap,
              w_cv2_y, w_cv2_z, b_cv2, tap_mask, pool_h, pool_w, exp_h, exp_w)

    def whole(a):
        # Whole-array block with a constant index_map -> stays resident in VMEM.
        # (At production sizes, pipeline_mode=pl.Buffered(1) on these specs
        #  would avoid double-buffering the resident constants.)
        return pl.BlockSpec(a.shape, lambda b, nd=a.ndim: (0,) * nd)

    kernel = functools.partial(_msfm_kernel, H=H, W=W, c=c,
                               shift_sign=_roll_shift_sign())

    flops = (2 * B * HW * (C1 * 2 * c + 2 * 9 * c * c + 2 * (H + W) * c
                           + 3 * c * C2) + 2 * B * c * c * H)
    transcendentals = B * (HW * (2 * c + 2 * c + C2) + c * (2 * H + 2 * W + 2))
    const_bytes = sum(int(a.size) * a.dtype.itemsize for a in consts)
    bytes_accessed = int(x_flat.size) * 4 + B * C2 * HW * 4 + const_bytes

    out = pl.pallas_call(
        kernel,
        out_shape=jax.ShapeDtypeStruct((B, C2, HW), jnp.float32),
        grid=(B,),
        in_specs=[pl.BlockSpec((None, C1, HW), lambda b: (b, 0, 0))]
                 + [whole(a) for a in consts],
        out_specs=pl.BlockSpec((None, C2, HW), lambda b: (b, 0, 0)),
        scratch_shapes=[pltpu.VMEM((9 * c, HW), jnp.float32)],
        compiler_params=pltpu.CompilerParams(
            dimension_semantics=("parallel",),
            vmem_limit_bytes=64 * 1024 * 1024),
        cost_estimate=pl.CostEstimate(flops=int(flops),
                                      transcendentals=int(transcendentals),
                                      bytes_accessed=int(bytes_accessed)),
    )(x_flat, *consts)

    # Free view back to NCHW.
    return out.reshape(B, C2, H, W)


# ---------------------------------------------------------------------------
# Pure-JAX reference (mirrors the PyTorch forward, NCHW, f32) for verification
# ---------------------------------------------------------------------------
def _conv_bn_silu_ref(x, p, pad, *, act=True):
    y = lax.conv_general_dilated(
        x, p["w"], window_strides=(1, 1),
        padding=[(pad[0], pad[0]), (pad[1], pad[1])],
        dimension_numbers=("NCHW", "OIHW", "NCHW"))
    scale = p["gamma"] / jnp.sqrt(p["var"] + BN_EPS)
    bias = p["beta"] - p["mean"] * scale
    y = y * scale[None, :, None, None] + bias[None, :, None, None]
    return y * jax.nn.sigmoid(y) if act else y


def _matchneck_inner_ref(x, gap_p):
    B, C, H, W = x.shape
    ph = jnp.mean(x, axis=3, keepdims=True)                               # (B,C,H,1)
    pw = jnp.transpose(jnp.mean(x, axis=2, keepdims=True), (0, 1, 3, 2))  # (B,C,W,1)
    pooled = jnp.mean(x, axis=(2, 3), keepdims=True)                      # (B,C,1,1)
    pch = _conv_bn_silu_ref(pooled, gap_p, (0, 0))
    hw = jnp.concatenate([ph, pw], axis=2)
    w_sig = jax.nn.sigmoid(hw)
    wh, ww = w_sig[:, :, :H], w_sig[:, :, H:]
    ph_g, pw_g = ph * wh, pw * ww
    pch = pch * jnp.mean(w_sig, axis=2, keepdims=True)
    return (x * jax.nn.sigmoid(ph_g)
              * jnp.transpose(jax.nn.sigmoid(pw_g), (0, 1, 3, 2))
              * jax.nn.sigmoid(pch))


def msfm_ref(x, params, c):
    y = _conv_bn_silu_ref(x, params["cv1"], (0, 0))
    y0, y1 = y[:, :c], y[:, c:]
    z = _conv_bn_silu_ref(y1, params["m0_cv1"], (1, 1))
    z = _conv_bn_silu_ref(z, params["m0_cv2"], (1, 1))
    z = _matchneck_inner_ref(z, params["m0_gap"])
    return _conv_bn_silu_ref(jnp.concatenate([y0, y1, z], axis=1),
                             params["cv2"], (0, 0))


# ---------------------------------------------------------------------------
# Deterministic parameter init (eval-mode BatchNorm statistics)
# ---------------------------------------------------------------------------
def _init_conv(key, cin, cout, kh, kw):
    k1, k2, k3, k4, k5 = jax.random.split(key, 5)
    fan_in = cin * kh * kw
    return dict(
        w=jax.random.normal(k1, (cout, cin, kh, kw), jnp.float32) / jnp.sqrt(fan_in),
        gamma=1.0 + 0.1 * jax.random.normal(k2, (cout,), jnp.float32),
        beta=0.1 * jax.random.normal(k3, (cout,), jnp.float32),
        mean=0.1 * jax.random.normal(k4, (cout,), jnp.float32),
        var=0.5 + jax.random.uniform(k5, (cout,), jnp.float32),
    )


if __name__ == "__main__":
    key = jax.random.PRNGKey(0)
    B, C1, C2, H, W, n, e = 2, 16, 16, 16, 16, 1, 0.5
    c = int(C2 * e)                                  # hidden width = 8

    kx, k1, k2, k3, k4, k5 = jax.random.split(key, 6)
    x = jax.random.normal(kx, (B, C1, H, W), jnp.float32)

    params = {
        "cv1": _init_conv(k1, C1, 2 * c, 1, 1),          # MSFM.cv1
        "cv2": _init_conv(k2, (2 + n) * c, C2, 1, 1),    # MSFM.cv2
        "m0_cv1": _init_conv(k3, c, c, 3, 3),            # MatchNeck.cv1
        "m0_cv2": _init_conv(k4, c, c, 3, 3),            # MatchNeck.cv2
        "m0_gap": _init_conv(k5, c, c, 1, 1),            # MatchNeck_Inner.gap conv
        # MatchNeck_Inner.conv_hw / conv_pool_hw exist in __init__ but are never
        # used in forward, so no parameters/compute are emitted for them.
    }

    out = jax.block_until_ready(msfm_forward(x, params, c))
    ref = jax.block_until_ready(msfm_ref(x, params, c))

    assert out.shape == (B, C2, H, W), out.shape
    # Tolerance covers bf16 MXU operands (f32 accumulation/epilogue) vs the
    # pure-f32 reference across the 5-conv chain.
    assert bool(jnp.allclose(out, ref, rtol=5e-2, atol=5e-2)), \
        float(jnp.max(jnp.abs(out - ref)))
    print("KERNEL_OK")
</pallas_src>

<mosaic_0001>
module attributes {stable_mosaic.version = 11 : i64} {
  func.func @probe(%arg0: memref<8x128xf32, #tpu.memory_space<vmem>>, %arg1: memref<8x128xf32, #tpu.memory_space<vmem>>) attributes {dimension_semantics = [], scalar_prefetch = 0 : i64, scratch_operands = 0 : i64, tpu.core_type = #tpu.core_type<tc>} {
    %c0 = arith.constant 0 : index
    %c0_0 = arith.constant 0 : index
    %0 = vector.load %arg0[%c0, %c0_0] : memref<8x128xf32, #tpu.memory_space<vmem>>, vector<8x128xf32>
    %c1_i32 = arith.constant 1 : i32
    %1 = tpu.dynamic_rotate %0 by %c1_i32 dim 1 : vector<8x128xf32>, i32 -> vector<8x128xf32>
    %c0_1 = arith.constant 0 : index
    %c0_2 = arith.constant 0 : index
    %2 = vector.load %arg1[%c0_1, %c0_2] : memref<8x128xf32, #tpu.memory_space<vmem>>, vector<8x128xf32>
    tpu.vector_store %arg1[%c0_1, %c0_2], %1 {strides = array<i32>} : memref<8x128xf32, #tpu.memory_space<vmem>>, vector<8x128xf32>,
    return
  }
}

</mosaic_0001>

<bundles_post_ra>
// kernel: tpu_custom_call.1
= control target key start
LH: loop header
LB: loop body
LE: loop exit
PB: predicated region body
PF: predicated region fallthrough
CT: control target
= control target key end

     0   :  { %6 = vsyncpa [#allocation3], 0  ;;  %s128_s0 = inlined_call_operand.hbm [shape: f32[8,128], index: 0, kind: input, shape index: {}]   ;;  %s129_s1 = inlined_call_operand.hbm [shape: f32[8,128], index: 1, kind: output, shape index: {}]  }
   0x1   :  { %7 = vsyncpa [#allocation4], 0  ;;  %s91_s6 = smov [#allocation2]   ;;  %s43_s10 = scalar_lea.hbm %s128_s0, 128 }
   0x2   :  { %s14_s7 = sshll.u32 %s91_s6, 4  ;;  %p44_p0 = scmp.ne.s32.totalorder %s128_s0, %s43_s10  ;;  %s15_s7 = int_to_ptr.vmem [resolvable:$true] %s14_s7 }
   0x3   :  { %p47_p1 = scmp.lt.u32.totalorder %s43_s10, %s128_s0 }
   0x5   :  { %p49_p2 = pnand %p47_p1, %p44_p0 }
   0x7   :  { %52 = shalt.err (!%p49_p2)
}
   0x8   :  { %s53_s15 = scalar_lea.vmem %s15_s7, 128  ;;  %p58_p4 = scmp.lt.s32.totalorder %s15_s7, %s15_s7 }
   0x9   :  { %p54_p3 = scmp.ne.s32.totalorder %s15_s7, %s53_s15  ;;  %p59_p5 = scmp.lt.s32.totalorder %s53_s15, %s53_s15 }
   0xb   :  { %p60_p6 = por %p59_p5, %p58_p4 }
   0xd   :  { %p61_p7 = pnand %p60_p6, %p54_p3 }
   0xf   :  { %64 = shalt.err (!%p61_p7)
}
  0x10   :  { %17 = dma.hbm_to_vmem [thread:$0]  %s128_s0, 128, %s15_s7, [#allocation3]  }
  0x11   :  { %87 = dma.done.wait [#allocation3], 128  }
  0x12   :  { %88 = vsyncadd [#allocation3], 4294967168  ;;  %v21_v0 = vld [vmem:[#allocation2] sm:$0xff]  ;;  %s92_s18 = smov 1   ;;  %s93_s19 = smov [#allocation5]  }
  0x13   :  { %22 = vrot.lane.b32.xlu0 %v21_v0, %s92_s18  ;;  %s31_s20 = sshll.u32 %s93_s19, 4  ;;  %s32_s20 = int_to_ptr.vmem [resolvable:$true] %s31_s20 }
  0x14   :  { %s65_s21 = scalar_lea.vmem %s32_s20, 128  ;;  %p70_p9 = scmp.lt.s32.totalorder %s32_s20, %s32_s20 }
  0x15   :  { %p66_p8 = scmp.ne.s32.totalorder %s32_s20, %s65_s21  ;;  %p71_p10 = scmp.lt.s32.totalorder %s65_s21, %s65_s21 }
  0x17   :  { %p72_p11 = por %p71_p10, %p70_p9 }
  0x19   :  { %p73_p12 = pnand %p72_p11, %p66_p8 }
  0x85   :  { %v23_v1 = vpop.permute.xlu0 %22 }
  0x86   :  { %24 = vst [vmem:[#allocation5] sm:$0xff] %v23_v1 }
  0x87   :  { %76 = shalt.err (!%p73_p12)
}
  0x88   :  { %s77_s0 = scalar_lea.hbm %s129_s1, 128 }
  0x89   :  { %p78_p13 = scmp.ne.s32.totalorder %s129_s1, %s77_s0  ;;  %p81_p0 = scmp.lt.u32.totalorder %s77_s0, %s129_s1 }
  0x8b   :  { %p83_p1 = pnand %p81_p0, %p78_p13 }
  0x8d   :  { %86 = shalt.err (!%p83_p1)
}
  0x8e   :  { %34 = dma.vmem_to_hbm [thread:$0]  %s32_s20, 128, %s129_s1, [#allocation4]  }
  0x8f   :  { %89 = dma.done.wait [#allocation4], 128  }
  0x90   :  { %90 = vsyncadd [#allocation4], 4294967168 }
  0x91   :  { %38 = vsyncpa [#allocation3], 1 }
  0x92   :  { %39 = vsyncpa [#allocation4], 1 }

</bundles_post_ra>
